<compile_context>
chip_gen: v7x
topology: tpu7x:2x2x1
jax: 0.10.0
libtpu: 0.0.40
codegen_flags: <defaults>
</compile_context>

<pallas_src>
from functools import partial

import jax
import jax.numpy as jnp
from jax.experimental import pallas as pl
from jax.experimental.pallas import tpu as pltpu


# ------------------------------ Pallas kernel --------------------------------

def _fused_attn_kernel(x_ref, mask_ref, wqkv_ref, wo_ref, bo_ref, o_ref, *,
                       b_tile, heads, dim_head, npad, dim, scale):
    inner = heads * dim_head
    rows = b_tile * npad

    # ---- fused q/k/v projection: one MXU matmul, bf16 operands, f32 acc ----
    xb = x_ref[...].reshape(rows, dim).astype(jnp.bfloat16)
    qkv = jnp.dot(xb, wqkv_ref[...], preferred_element_type=jnp.float32)   # (rows, 3*inner) f32

    q = qkv[:, :inner]
    k = qkv[:, inner:2 * inner]
    v = qkv[:, 2 * inner:]

    # ---- single relayout per tensor: (B*N, H*dh) -> (B*H, N, dh) ----
    def to_heads(t):
        t = t.reshape(b_tile, npad, heads, dim_head)
        return jnp.transpose(t, (0, 2, 1, 3)).reshape(b_tile * heads, npad, dim_head)

    qh = to_heads(q).astype(jnp.bfloat16)
    kh = to_heads(k).astype(jnp.bfloat16)
    vh = to_heads(v).astype(jnp.bfloat16)

    # ---- scores, batched over (B_tile*H); scale + key-padding bias in f32 ----
    s = jnp.einsum('gid,gjd->gij', qh, kh,
                   preferred_element_type=jnp.float32)                     # (B*H, N, N)
    s = s * scale

    # key-padding additive bias built in-kernel from the tiny (B_tile,1,N) mask
    neg = jnp.where(mask_ref[...] > 0.5, 0.0, -1e30).astype(jnp.float32)   # (B,1,N)
    neg = jnp.broadcast_to(neg[:, None, :, :], (b_tile, heads, 1, npad))
    s = s + neg.reshape(b_tile * heads, 1, npad)

    # ---- softmax in f32 (exp on EUP, approx reciprocal on EUP) ----
    s = s - jnp.max(s, axis=-1, keepdims=True)
    p = jnp.exp(s)
    p = p * pl.reciprocal(jnp.sum(p, axis=-1, keepdims=True), approx=True)

    # ---- attention * V (bf16 operands, f32 acc) ----
    o = jnp.einsum('gij,gjd->gid', p.astype(jnp.bfloat16), vh,
                   preferred_element_type=jnp.float32)                     # (B*H, N, dh)

    # ---- single relayout back: (B*H, N, dh) -> (B*N, H*dh) ----
    o = o.reshape(b_tile, heads, npad, dim_head)
    o = jnp.transpose(o, (0, 2, 1, 3)).reshape(rows, inner)

    # ---- output projection + bias; one contiguous slab store per step ----
    out = jnp.dot(o.astype(jnp.bfloat16), wo_ref[...],
                  preferred_element_type=jnp.float32) + bo_ref[...]
    o_ref[...] = out.reshape(b_tile, npad, dim).astype(o_ref.dtype)


# -------------------------------- wrapper -------------------------------------

def _pick_b_tile(b, npad):
    """Batch rows per grid step: grow toward ~128 MXU rows per step, but keep
    >= 2 grid steps when b > 1 so both v7x TensorCores get work."""
    if b <= 1:
        return 1
    target = max(1, 128 // max(npad, 1))
    best = 1
    for cand in range(1, b + 1):
        if b % cand == 0 and cand <= target and (b // cand) >= 2:
            best = cand
    return best


def sparse_attention_forward(x, mask, params, *, heads, dim_head, block_size,
                             b_tile=None):
    """Mirrors SparseAttention.forward.  x: (B, N, dim), mask: (B, N) bool or None."""
    b, n, dim = x.shape
    inner = heads * dim_head
    scale = float(dim_head) ** -0.5

    # pad seq to a multiple of block_size (F.pad with zeros / False)
    rem = n % block_size
    if rem > 0:
        pad = block_size - rem
        x = jnp.pad(x, ((0, 0), (0, pad), (0, 0)))
        if mask is not None:
            mask = jnp.pad(mask, ((0, 0), (0, pad)), constant_values=False)
    npad = x.shape[1]
    if mask is None:
        mask = jnp.ones((b, npad), dtype=bool)

    if b_tile is None:
        b_tile = _pick_b_tile(b, npad)
    assert b % b_tile == 0, (b, b_tile)

    # bf16 MXU operands (f32 accumulation in-kernel); softmax path stays f32.
    wqkv = jnp.concatenate([params["wq"], params["wkv"]], axis=1).astype(jnp.bfloat16)
    wo = params["wo"].astype(jnp.bfloat16)
    bo = params["bo"].reshape(1, dim).astype(jnp.float32)
    maskf = mask.astype(jnp.float32)[:, None, :]          # (B, 1, npad) — O(N) bytes

    kern = partial(_fused_attn_kernel, b_tile=b_tile, heads=heads,
                   dim_head=dim_head, npad=npad, dim=dim, scale=scale)

    out = pl.pallas_call(
        kern,
        out_shape=jax.ShapeDtypeStruct((b, npad, dim), jnp.float32),
        grid=(b // b_tile,),
        in_specs=[
            pl.BlockSpec((b_tile, npad, dim), lambda i: (i, 0, 0)),   # x (per batch tile)
            pl.BlockSpec((b_tile, 1, npad), lambda i: (i, 0, 0)),     # key mask (tiny)
            pl.BlockSpec((dim, 3 * inner), lambda i: (0, 0)),         # wqkv (resident, bf16)
            pl.BlockSpec((inner, dim), lambda i: (0, 0)),             # wo (resident, bf16)
            pl.BlockSpec((1, dim), lambda i: (0, 0)),                 # bo (resident)
        ],
        out_specs=pl.BlockSpec((b_tile, npad, dim), lambda i: (i, 0, 0)),
        compiler_params=pltpu.CompilerParams(dimension_semantics=("parallel",)),
    )(x, maskf, wqkv, wo, bo)

    return out[:, :n]


# --------------------------- pure-JAX reference --------------------------------

def _ref_forward(x, mask, params, *, heads, dim_head, block_size):
    b, n, dim = x.shape
    inner = heads * dim_head
    scale = float(dim_head) ** -0.5
    rem = n % block_size
    if rem > 0:
        pad = block_size - rem
        x = jnp.pad(x, ((0, 0), (0, pad), (0, 0)))
        mask = jnp.pad(mask, ((0, 0), (0, pad)), constant_values=False)
    npad = x.shape[1]
    q = x @ params["wq"]
    kv = x @ params["wkv"]
    k, v = kv[..., :inner], kv[..., inner:]

    def split(t):
        return t.reshape(b, npad, heads, dim_head).transpose(0, 2, 1, 3)

    q, k, v = split(q), split(k), split(v)
    dots = jnp.einsum("bhid,bhjd->bhij", q, k) * scale
    dots = jnp.where(mask[:, None, None, :], dots, -1e30)
    attn = jax.nn.softmax(dots, axis=-1)
    o = jnp.einsum("bhij,bhjd->bhid", attn, v)
    o = o.transpose(0, 2, 1, 3).reshape(b, npad, inner)
    out = o @ params["wo"] + params["bo"]
    return out[:, :n]


# ---------------------------------- main ---------------------------------------

if __name__ == "__main__":
    B, N, DIM = 2, 14, 32
    HEADS, DIM_HEAD = 4, 16
    BLOCK_SIZE = 16          # seq_len = 16 -> single sparse block -> dense-exact
    INNER = HEADS * DIM_HEAD

    key = jax.random.PRNGKey(0)
    kx, kq, kkv, kwo, kbo = jax.random.split(key, 5)

    x = jax.random.normal(kx, (B, N, DIM), jnp.float32)
    # deterministic key-padding mask: batch0 keeps first 10 tokens, batch1 all 14
    mask = jnp.arange(N)[None, :] < jnp.array([10, 14])[:, None]

    params = {
        "wq":  jax.random.normal(kq,  (DIM, INNER), jnp.float32) / jnp.sqrt(DIM),
        "wkv": jax.random.normal(kkv, (DIM, 2 * INNER), jnp.float32) / jnp.sqrt(DIM),
        "wo":  jax.random.normal(kwo, (INNER, DIM), jnp.float32) / jnp.sqrt(INNER),
        "bo":  jax.random.normal(kbo, (DIM,), jnp.float32) * 0.01,
    }

    out = sparse_attention_forward(
        x, mask, params, heads=HEADS, dim_head=DIM_HEAD, block_size=BLOCK_SIZE
    )
    jax.block_until_ready(out)

    ref = _ref_forward(x, mask, params, heads=HEADS, dim_head=DIM_HEAD,
                       block_size=BLOCK_SIZE)

    assert out.shape == (B, N, DIM), out.shape
    assert jnp.all(jnp.isfinite(out))
    # Tolerance accounts for bf16 MXU operands (f32 accumulation) + approx reciprocal.
    assert jnp.allclose(out, ref, atol=3e-2, rtol=3e-2), float(jnp.max(jnp.abs(out - ref)))
    print("KERNEL_OK")
</pallas_src>

<mosaic_0001>
module attributes {stable_mosaic.version = 11 : i64} {
  func.func @_fused_attn_kernel(%arg0: i32, %arg1: memref<1x16x32xf32, #tpu.memory_space<vmem>>, %arg2: memref<1x1x16xf32, #tpu.memory_space<vmem>>, %arg3: memref<32x192xbf16, #tpu.memory_space<vmem>>, %arg4: memref<64x32xbf16, #tpu.memory_space<vmem>>, %arg5: memref<1x32xf32, #tpu.memory_space<vmem>>, %arg6: memref<1x16x32xf32, #tpu.memory_space<vmem>>) attributes {dimension_semantics = [#tpu.dimension_semantics<parallel>], iteration_bounds = array<i64: 2>, scalar_prefetch = 0 : i64, scratch_operands = 0 : i64, tpu.core_type = #tpu.core_type<tc>, window_params = [{transform_indices = @transform_0, window_bounds = array<i64: 1, 16, 32>}, {transform_indices = @transform_1, window_bounds = array<i64: 1, 1, 16>}, {pipeline_mode = #tpu.pipeline_mode<synchronous>, transform_indices = @transform_2, window_bounds = array<i64: 32, 192>}, {pipeline_mode = #tpu.pipeline_mode<synchronous>, transform_indices = @transform_3, window_bounds = array<i64: 64, 32>}, {pipeline_mode = #tpu.pipeline_mode<synchronous>, transform_indices = @transform_4, window_bounds = array<i64: 1, 32>}, {transform_indices = @transform_5, window_bounds = array<i64: 1, 16, 32>}]} {
    %c0 = arith.constant 0 : index
    %c0_0 = arith.constant 0 : index
    %c0_1 = arith.constant 0 : index
    %0 = vector.load %arg1[%c0, %c0_0, %c0_1] : memref<1x16x32xf32, #tpu.memory_space<vmem>>, vector<1x16x32xf32>
    %1 = vector.shape_cast %0 : vector<1x16x32xf32> to vector<16x32xf32>
    %2 = arith.truncf %1 : vector<16x32xf32> to vector<16x32xbf16>
    %c0_2 = arith.constant 0 : index
    %c0_3 = arith.constant 0 : index
    %3 = vector.load %arg3[%c0_2, %c0_3] : memref<32x192xbf16, #tpu.memory_space<vmem>>, vector<32x192xbf16>
    %cst = arith.constant dense<0.000000e+00> : vector<16x192xf32>
    %4 = tpu.matmul %2, %3, %cst {dimension_numbers = #tpu.dot_dimension_numbers<[1], [0], [0], [1], [0, 0, 1, 1], [], []>} : vector<16x32xbf16>, vector<32x192xbf16>, vector<16x192xf32> -> vector<16x192xf32>
    %5 = vector.extract_strided_slice %4 {offsets = [0, 0], sizes = [16, 64], strides = [1, 1]} : vector<16x192xf32> to vector<16x64xf32>
    %6 = vector.extract_strided_slice %4 {offsets = [0, 64], sizes = [16, 64], strides = [1, 1]} : vector<16x192xf32> to vector<16x64xf32>
    %7 = vector.extract_strided_slice %4 {offsets = [0, 128], sizes = [16, 64], strides = [1, 1]} : vector<16x192xf32> to vector<16x64xf32>
    %8 = vector.shape_cast %5 : vector<16x64xf32> to vector<1x16x4x16xf32>
    %9 = tpu.transpose %8, [0, 2, 1, 3] : vector<1x16x4x16xf32> -> vector<1x4x16x16xf32>
    %10 = vector.shape_cast %9 : vector<1x4x16x16xf32> to vector<4x16x16xf32>
    %11 = arith.truncf %10 : vector<4x16x16xf32> to vector<4x16x16xbf16>
    %12 = vector.shape_cast %6 : vector<16x64xf32> to vector<1x16x4x16xf32>
    %13 = tpu.transpose %12, [0, 2, 1, 3] : vector<1x16x4x16xf32> -> vector<1x4x16x16xf32>
    %14 = vector.shape_cast %13 : vector<1x4x16x16xf32> to vector<4x16x16xf32>
    %15 = arith.truncf %14 : vector<4x16x16xf32> to vector<4x16x16xbf16>
    %16 = vector.shape_cast %7 : vector<16x64xf32> to vector<1x16x4x16xf32>
    %17 = tpu.transpose %16, [0, 2, 1, 3] : vector<1x16x4x16xf32> -> vector<1x4x16x16xf32>
    %18 = vector.shape_cast %17 : vector<1x4x16x16xf32> to vector<4x16x16xf32>
    %19 = arith.truncf %18 : vector<4x16x16xf32> to vector<4x16x16xbf16>
    "tpu.trace_start"() <{level = 10 : i32, message = "gid,gjd->gij"}> : () -> ()
    %cst_4 = arith.constant dense<0.000000e+00> : vector<4x16x16xf32>
    %20 = tpu.matmul %11, %15, %cst_4 {dimension_numbers = #tpu.dot_dimension_numbers<[2], [2], [1], [1], [0, 0, 0, 1, 1, 1], [0], [0]>} : vector<4x16x16xbf16>, vector<4x16x16xbf16>, vector<4x16x16xf32> -> vector<4x16x16xf32>
    "tpu.trace_stop"() : () -> ()
    %cst_5 = arith.constant 2.500000e-01 : f32
    %21 = vector.broadcast %cst_5 : f32 to vector<4x16x16xf32>
    %22 = arith.mulf %20, %21 : vector<4x16x16xf32>
    %c0_6 = arith.constant 0 : index
    %c0_7 = arith.constant 0 : index
    %c0_8 = arith.constant 0 : index
    %23 = vector.load %arg2[%c0_6, %c0_7, %c0_8] : memref<1x1x16xf32, #tpu.memory_space<vmem>>, vector<1x1x16xf32>
    %cst_9 = arith.constant 5.000000e-01 : f32
    %24 = vector.broadcast %cst_9 : f32 to vector<1x1x16xf32>
    %25 = arith.cmpf ogt, %23, %24 : vector<1x1x16xf32>
    %cst_10 = arith.constant 0.000000e+00 : f32
    %cst_11 = arith.constant -1.000000e+30 : f32
    %26 = vector.broadcast %cst_10 : f32 to vector<1x1x16xf32>
    %27 = vector.broadcast %cst_11 : f32 to vector<1x1x16xf32>
    %28 = arith.select %25, %26, %27 : vector<1x1x16xi1>, vector<1x1x16xf32>
    %29 = vector.shape_cast %28 : vector<1x1x16xf32> to vector<1x1x1x16xf32>
    %30 = vector.shape_cast %29 : vector<1x1x1x16xf32> to vector<1x1x1x16xf32>
    %31 = vector.broadcast %30 : vector<1x1x1x16xf32> to vector<1x4x1x16xf32>
    %32 = vector.shape_cast %31 : vector<1x4x1x16xf32> to vector<4x1x16xf32>
    %33 = vector.broadcast %32 : vector<4x1x16xf32> to vector<4x16x16xf32>
    %34 = arith.addf %22, %33 : vector<4x16x16xf32>
    %cst_12 = arith.constant dense<0xFF800000> : vector<4x16xf32>
    %35 = vector.multi_reduction <maximumf>, %34, %cst_12 [2] : vector<4x16x16xf32> to vector<4x16xf32>
    %36 = vector.shape_cast %35 : vector<4x16xf32> to vector<4x16x1xf32>
    %37 = vector.broadcast %36 : vector<4x16x1xf32> to vector<4x16x16xf32>
    %38 = arith.subf %34, %37 : vector<4x16x16xf32>
    %39 = math.exp %38 : vector<4x16x16xf32>
    %cst_13 = arith.constant dense<0.000000e+00> : vector<4x16xf32>
    %40 = vector.multi_reduction <add>, %39, %cst_13 [2] : vector<4x16x16xf32> to vector<4x16xf32>
    %41 = vector.shape_cast %40 : vector<4x16xf32> to vector<4x16x1xf32>
    %42 = tpu.reciprocal %41 {approx = true} : vector<4x16x1xf32> -> vector<4x16x1xf32>
    %43 = vector.broadcast %42 : vector<4x16x1xf32> to vector<4x16x16xf32>
    %44 = arith.mulf %39, %43 : vector<4x16x16xf32>
    %45 = arith.truncf %44 : vector<4x16x16xf32> to vector<4x16x16xbf16>
    "tpu.trace_start"() <{level = 10 : i32, message = "gij,gjd->gid"}> : () -> ()
    %cst_14 = arith.constant dense<0.000000e+00> : vector<4x16x16xf32>
    %46 = tpu.matmul %45, %19, %cst_14 {dimension_numbers = #tpu.dot_dimension_numbers<[2], [1], [1], [2], [0, 0, 0, 1, 1, 2], [0], [0]>} : vector<4x16x16xbf16>, vector<4x16x16xbf16>, vector<4x16x16xf32> -> vector<4x16x16xf32>
    "tpu.trace_stop"() : () -> ()
    %47 = vector.shape_cast %46 : vector<4x16x16xf32> to vector<1x4x16x16xf32>
    %48 = tpu.transpose %47, [0, 2, 1, 3] : vector<1x4x16x16xf32> -> vector<1x16x4x16xf32>
    %49 = vector.shape_cast %48 : vector<1x16x4x16xf32> to vector<16x64xf32>
    %50 = arith.truncf %49 : vector<16x64xf32> to vector<16x64xbf16>
    %c0_15 = arith.constant 0 : index
    %c0_16 = arith.constant 0 : index
    %51 = vector.load %arg4[%c0_15, %c0_16] : memref<64x32xbf16, #tpu.memory_space<vmem>>, vector<64x32xbf16>
    %cst_17 = arith.constant dense<0.000000e+00> : vector<16x32xf32>
    %52 = tpu.matmul %50, %51, %cst_17 {dimension_numbers = #tpu.dot_dimension_numbers<[1], [0], [0], [1], [0, 0, 1, 1], [], []>} : vector<16x64xbf16>, vector<64x32xbf16>, vector<16x32xf32> -> vector<16x32xf32>
    %c0_18 = arith.constant 0 : index
    %c0_19 = arith.constant 0 : index
    %53 = vector.load %arg5[%c0_18, %c0_19] : memref<1x32xf32, #tpu.memory_space<vmem>>, vector<1x32xf32>
    %54 = vector.broadcast %53 : vector<1x32xf32> to vector<16x32xf32>
    %55 = arith.addf %52, %54 : vector<16x32xf32>
    %56 = vector.shape_cast %55 : vector<16x32xf32> to vector<1x16x32xf32>
    %c0_20 = arith.constant 0 : index
    %c0_21 = arith.constant 0 : index
    %c0_22 = arith.constant 0 : index
    %57 = vector.load %arg6[%c0_20, %c0_21, %c0_22] : memref<1x16x32xf32, #tpu.memory_space<vmem>>, vector<1x16x32xf32>
    tpu.vector_store %arg6[%c0_20, %c0_21, %c0_22], %56 {strides = array<i32>} : memref<1x16x32xf32, #tpu.memory_space<vmem>>, vector<1x16x32xf32>,
    return
  }
  func.func @transform_0(%arg0: i32) -> (i32, i32, i32) {
    %c0_i32 = arith.constant 0 : i32
    %c0_i32_0 = arith.constant 0 : i32
    %c0_i32_1 = arith.constant 0 : i32
    return %arg0, %c0_i32, %c0_i32_0 : i32, i32, i32
  }
  func.func @transform_1(%arg0: i32) -> (i32, i32, i32) {
    %c0_i32 = arith.constant 0 : i32
    %c0_i32_0 = arith.constant 0 : i32
    %c0_i32_1 = arith.constant 0 : i32
    return %arg0, %c0_i32, %c0_i32_0 : i32, i32, i32
  }
  func.func @transform_2(%arg0: i32) -> (i32, i32) {
    %c0_i32 = arith.constant 0 : i32
    %c0_i32_0 = arith.constant 0 : i32
    %c0_i32_1 = arith.constant 0 : i32
    return %c0_i32, %c0_i32_0 : i32, i32
  }
  func.func @transform_3(%arg0: i32) -> (i32, i32) {
    %c0_i32 = arith.constant 0 : i32
    %c0_i32_0 = arith.constant 0 : i32
    %c0_i32_1 = arith.constant 0 : i32
    return %c0_i32, %c0_i32_0 : i32, i32
  }
  func.func @transform_4(%arg0: i32) -> (i32, i32) {
    %c0_i32 = arith.constant 0 : i32
    %c0_i32_0 = arith.constant 0 : i32
    %c0_i32_1 = arith.constant 0 : i32
    return %c0_i32, %c0_i32_0 : i32, i32
  }
  func.func @transform_5(%arg0: i32) -> (i32, i32, i32) {
    %c0_i32 = arith.constant 0 : i32
    %c0_i32_0 = arith.constant 0 : i32
    %c0_i32_1 = arith.constant 0 : i32
    return %arg0, %c0_i32, %c0_i32_0 : i32, i32, i32
  }
}

</mosaic_0001>

<bundles_post_ra>
// kernel: tpu_custom_call.1
= control target key start
LH: loop header
LB: loop body
LE: loop exit
PB: predicated region body
PF: predicated region fallthrough
CT: control target
= control target key end

     0   :  { %10 = vsyncpa [#allocation3], 0  ;;  %s3037_s0 = inlined_call_operand.vmem [shape: f32[2,16,32], index: 0, kind: input, shape index: {}]   ;;  %s3038_s1 = inlined_call_operand.vmem [shape: f32[2,1,16], index: 1, kind: input, shape index: {}]   ;;  %s3039_s2 = inlined_call_operand.hbm [shape: bf16[32,192], index: 2, kind: input, shape index: {}]   ;;  %s3040_s3 = inlined_call_operand.vmem [shape: bf16[64,32], index: 3, kind: input, shape index: {}]   ;;  %s3041_s4 = inlined_call_operand.vmem [shape: f32[1,32], index: 4, kind: input, shape index: {}]   ;;  %s3042_s5 = inlined_call_operand.hbm [shape: f32[2,16,32], index: 5, kind: output, shape index: {}]  }
   0x1   :  { %11 = vsyncpa [#allocation4], 0 }
   0x2   :  { %13 = vsyncpa [#allocation4 + $0x1], 0  ;;  %s2589_s18 = smov 0   ;;  %s2591_s19 = smov 0  }
   0x3   :  { %s2593_s20 = smov 0   ;;  %s2595_s21 = smov 0  }
   0x4 LB: > { %s2610_s22 = sadd.s32 4294967295, %s2538_s21   ;;  %s2188_s23 = sadd.s32 4294967294, %s2538_s21   ;;  %s2538_s21 = sphi %s2595_s21, %s3058_s21   ;;  %s2534_s20 = sphi %s2593_s20, %s3057_s20   ;;  %s2530_s19 = sphi %s2591_s19, %s3056_s19   ;;  %s2526_s18 = sphi %s2589_s18, %s3055_s18  }
   0x5   : > { %s2614_s24 = sadd.s32 1, %s2538_s21   ;;  %s141_s25 = sadd.s32 1, %s2534_s20 }
   0x6   : > { %s138_s26 = ssub.s32 %s2538_s21, %s2614_s24  ;;  %p151_p0 = scmp.ne.s32.totalorder %s2534_s20, %s2530_s19 }
   0x7   : > { %p139_p1 = scmp.eq.s32.totalorder %s138_s26, 0  ;;  %p152_p2 = scmp.eq.s32.totalorder %s2610_s22, 1 }
   0x8   : > { %p157_p3 = scmp.ne.s32.totalorder %s2530_s19, %s2526_s18  ;;  %p158_p4 = scmp.eq.s32.totalorder %s2188_s23, 1 }
   0x9   : > { %s2625_s27 = scalar_select %p139_p1, %s2534_s20, %s141_s25  }
   0xa   : > { %p2627_p5 = por %p152_p2, %p151_p0  ;;  %p2631_p6 = por %p158_p4, %p157_p3 }
   0xb   : > { %p2189_p7 = scmp.ge.s32.totalorder %s2538_s21, 1  ;;  %p165_p8 = scmp.lt.s32.totalorder %s2538_s21, 3 }
   0xc   : > { %s3046_s28 = scalar_select %p2627_p5, 1, 0 }
   0xd   : > { %s3047_s29 = scalar_select %p2631_p6, 1, 0 }
   0xe   : > { %p3043_p9 = scmp.eq.s32.totalorder %s2610_s22, 0  ;;  %p2638_p10 = pnand %p2189_p7, %p165_p8 }
   0xf   : > { %s2540_s6 = smov [#allocation2]   ;;  %s2444_s11 = scalar_lea.hbm %s3039_s2, 512 }
  0x10   : > { %s3048_s30 = scalar_select %p2638_p10, 1, 0 }
  0x11   : > { %s177_s7 = sshll.u32 %s2540_s6, 4  ;;  %p2326_p11 = pneg %p2638_p10  ;;  %s178_s7 = int_to_ptr.vmem [resolvable:$true] %s177_s7 }
  0x12   : > { %p2445_p13 = scmp.ne.s32.totalorder %s3039_s2, %s2444_s11  ;;  %p2451_p3 = scmp.lt.u32.totalorder %s2444_s11, %s3039_s2 }
  0x13   : > { %p2646_p12 = pnand %p3043_p9, %p2326_p11 }
  0x15   : > { %p2446_p0 = pneg %p2646_p12 }
  0x17   : > { %p2447_p1 = pnand %p2446_p0, %p2445_p13 }
  0x19   : > { %p2448_p2 = pneg %p2447_p1 }
  0x1b   : > { %p2453_p4 = pnand %p2451_p3, %p2448_p2 }
  0x1d   : > { %2456 = shalt.err (!%p2453_p4)
}
  0x1e   : > { %s2457_s16 = scalar_lea.vmem %s178_s7, 512  ;;  %p2465_p9 = scmp.lt.s32.totalorder %s178_s7, %s178_s7 }
  0x1f   : > { %p2458_p7 = scmp.ne.s32.totalorder %s178_s7, %s2457_s16  ;;  %p2466_p6 = scmp.lt.s32.totalorder %s2457_s16, %s2457_s16 }
  0x21   : > { %p2460_p8 = pnand %p2458_p7, %p2446_p0  ;;  %p2467_p5 = por %p2466_p6, %p2465_p9 }
  0x23   : > { %p2461_p11 = pneg %p2460_p8 }
  0x25   : > { %p2468_p10 = pnand %p2467_p5, %p2461_p11 }
  0x27   : > { %2471 = shalt.err (!%p2468_p10)
}
  0x28   : > { %s2541_s17 = smov 128   ;;  %s2542_s23 = smov 8  }
  0x29   : > { %2329 = dma.hbm_to_vmem [thread:$0]  (!%p2646_p12), %s3039_s2, 512, %s178_s7, [#allocation3], %s2541_s17, %s2541_s17, %s2542_s23  }
  0x2a   : > { %p3050_p13 = scmp.ne.s32.totalorder %s3048_s30, 0 }
  0x2b   : > { %p3051_p1 = scmp.eq.s32.totalorder (!%p3050_p13), %s2610_s22, 0 }
  0x2c   : > { %213 = sbr.rel (%p3050_p13) target bundleno = 1722 (0x6ba), region = 40 }
  0x33   : > { %2517 = dma.done.wait (%p3051_p1), [#allocation3], 512   ;;  %p3052_p0 = pmov %p3051_p1 }
  0x34   : > { %p244_p5 = scmp.lt.s32.totalorder %s2610_s22, 1  ;;  %v2543_v0 = vmov 0   ;;  %v352_v1 = vlaneseq  ;;  %v2402_v2 = vld [vmem:[#allocation2 + $0x4] ss:$8 sps:$4 sm:$0xff]   ;;  %v2404_v4 = vld [vmem:[#allocation2] ss:$8 sps:$4 sm:$0xff]  }
  0x35   : > { %2519 = vsyncadd (%p3052_p0), [#allocation3], 4294966784  ;;  %316 = vmatprep.mubr.bf16.mxu0 %v2543_v0  ;;  %284 = vmatprep.subr.bf16.mxu0 %v2402_v2  ;;  %v2405_v5 = vld [vmem:[#allocation2 + $0x14] ss:$8 sps:$4 sm:$0xff]   ;;  %v2407_v6 = vld [vmem:[#allocation2 + $0x10] ss:$8 sps:$4 sm:$0xff]  }
  0x36   : > { %s245_s6 = scalar_select %p244_p5, %s2610_s22, 1  ;;  %v353_v3 = vshrl.u32 %v352_v1, 7  ;;  %285 = vmatpush1.bf16.msra.mxu0 %v2404_v4  ;;  %v2544_v11 = vmov -1e+30   ;;  %vm280_vm1 = vcmask 261120   ;;  %v2551_v43 = vmov 0.0  }
  0x37   : > { %286 = vmatprep.subr.bf16.mxu0 %v2405_v5  ;;  %s2545_s13 = smov 96   ;;  %s2546_s14 = smov 112   ;;  %v2549_v19 = vmov 1983009808   ;;  %v2550_v25 = vmov 1934713408   ;;  %2260 = vmatprep.subr.bf16.mxu1 %v2551_v43 }
  0x38   : > { %s2237_s8 = sshll.u32 %s245_s6, 4  ;;  %s251_s12 = scalar_lea.vmem %s3038_s1, %s245_s6  ;;  %v1422_v8 = vsub.s32 0, %v353_v3  ;;  %v350_v20 = vunpack.c.l.s4 %v2549_v19  ;;  %v382_v26 = vunpack.c.l.s4 %v2550_v25  ;;  %vm2552_vm2 = vmmov 0  }
  0x39   : > { %s248_s7 = scalar_lea.vmem %s3037_s0, %s2237_s8  ;;  %v1416_v10 = vld [vmem:[%s251_s12] sm:$0x1]  ;;  %s2547_s15 = smov 80   ;;  %2262 = vmatprep.mubr.msk.bf16.mxu1 %vm2552_vm2, %v2551_v43  ;;  %vm1219_vm3 = vcmask 130048   ;;  %vm2001_vm4 = vcmask 392192   ;;  %vm2044_vm5 = vcmask 523264  }
  0x3a   : > { %v253_v7 = vld [vmem:[%s248_s7] sm:$0xff]  ;;  %v254_v9 = vld [vmem:[%s248_s7 + $0x8] sm:$0xff]  ;;  %vm1417_vm0 = vcmp.gt.f32.partialorder %v1416_v10, 0.5  ;;  %287 = vmatpush1.bf16.msra.mxu0 %v2407_v6  ;;  %s2548_s16 = smov 64   ;;  %v351_v27 = vunpack.c.0.s8 %v350_v20  ;;  %v383_v32 = vunpack.c.0.s8 %v382_v26  ;;  %s2553_s7 = smov 32  }
  0x3b   : > { %v1418_v12 = vsel %vm1417_vm0, 0.0, %v2544_v11  ;;  %v255_v13 = vpack.c.bf16 %v254_v9, %v253_v7  ;;  %2266 = vmatprep.subr.bf16.mxu0 %v2551_v43  ;;  %s2554_s30 = smov 16   ;;  %s2555_s11 = smov 48  }
  0x3c   : > { %v2680_v14 = vrot.slane %v1418_v12, %v1422_v8  ;;  %v2698_v33 = vsub.s32 %v351_v27, %v353_v3  ;;  %v2701_v40 = vsub.s32 %v383_v32, %v353_v3  ;;  %s241_s12 = sand.u32 1, %s2530_s19   ;;  %s2238_s23 = sshll.u32 %s2610_s22, 8 }
  0x3d   : > { %2201 = vmatmul.mubr.msk.bf16.vlgmr.msra.gmra.mrb[0].mxu0 %vm280_vm1, %v255_v13  ;;  %s2993_s6 = scalar_lea.hbm %s3042_s5, %s2238_s23  ;;  %s2996_s22 = scalar_lea.sflag [#allocation4], %s241_s12 }
  0x3e   : > { %2268 = vmatprep.mubr.msk.bf16.mxu0 %vm2552_vm2, %v2551_v43  ;;  %p3053_p9 = scmp.ne.s32.totalorder %s3046_s28, 0  ;;  %s2556_s9 = smov [#allocation5]  }
  0x3f   : > { %s2476_s10 = sshll.u32 %s2556_s9, 4  ;;  %s2477_s10 = int_to_ptr.vmem [resolvable:$false] %s2476_s10 }
 0x110   : > { %v318_v15 = vpop.f32.mrb[0].mxu0 }
 0x111   : > { %335 = vrot.lane.b32.xlu1 %v318_v15, %s2545_s13  ;;  %329 = vrot.lane.b32.xlu0 %v318_v15, %s2546_s14  ;;  %v2685_v16 = vpop.f32.mrb[1].mxu0 }
 0x112   : > { %v322_v17 = vpop.f32.mrb[2].mxu0 }
 0x113   : > { %v2687_v18 = vpop.f32.mrb[3].mxu0 }
 0x115   : > { %337 = vrot.lane.b32.xlu1 %v322_v17, %s2545_s13  ;;  %331 = vrot.lane.b32.xlu0 %v322_v17, %s2546_s14 }
 0x119   : > { %343 = vrot.lane.b32.xlu1 %v322_v17, %s2547_s15  ;;  %341 = vrot.lane.b32.xlu0 %v318_v15, %s2547_s15 }
 0x11d   : > { %625 = vrot.lane.b32.xlu1 %v322_v17, %s2548_s16  ;;  %623 = vrot.lane.b32.xlu0 %v318_v15, %s2548_s16 }
 0x183   : > { %v336_v21 = vpop.permute.xlu1 %335  ;;  %v330_v22 = vpop.permute.xlu0 %329 }
 0x184   : > { %v347_v23 = vcombine.low %v318_v15, %v336_v21  ;;  %v348_v24 = vcombine.high %v318_v15, %v336_v21  ;;  %627 = vrot.lane.b32.xlu0 %v330_v22, %s2548_s16 }
 0x186   : > { %v355_v48 = vrot.slane %v347_v23, %v2698_v33  ;;  %v362_v49 = vrot.slane %v348_v24, %v2698_v33 }
 0x187   : > { %v338_v28 = vpop.permute.xlu1 %337  ;;  %v332_v29 = vpop.permute.xlu0 %331 }
 0x188   : > { %v415_v30 = vcombine.low %v322_v17, %v338_v28  ;;  %v416_v31 = vcombine.high %v322_v17, %v338_v28  ;;  %631 = vrot.lane.b32.xlu0 %v336_v21, %s2548_s16  ;;  %629 = vrot.lane.b32.xlu1 %v332_v29, %s2548_s16 }
 0x18a   : > { %v423_v41 = vrot.slane %v415_v30, %v2698_v33  ;;  %v430_v42 = vrot.slane %v416_v31, %v2698_v33 }
 0x18b   : > { %v344_v34 = vpop.permute.xlu1 %343  ;;  %v342_v35 = vpop.permute.xlu0 %341 }
 0x18c   : > { %v431_v36 = vcombine.low %v332_v29, %v344_v34  ;;  %v432_v37 = vcombine.high %v332_v29, %v344_v34  ;;  %v363_v38 = vcombine.low %v330_v22, %v342_v35  ;;  %v364_v39 = vcombine.high %v330_v22, %v342_v35  ;;  %633 = vrot.lane.b32.xlu1 %v338_v28, %s2548_s16 }
 0x18d   : > { %635 = vrot.lane.b32.xlu0 %v342_v35, %s2548_s16 }
 0x18e   : > { %v439_v44 = vrot.slane %v431_v36, %v2698_v33  ;;  %v446_v45 = vrot.slane %v432_v37, %v2698_v33  ;;  %v371_v46 = vrot.slane %v363_v38, %v2698_v33  ;;  %v378_v47 = vrot.slane %v364_v39, %v2698_v33 }
 0x190   : > { %v447_v50 = vcombine.low %v423_v41, %v439_v44  ;;  %v448_v51 = vcombine.high %v423_v41, %v439_v44  ;;  %v463_v52 = vcombine.low %v430_v42, %v446_v45  ;;  %v464_v53 = vcombine.high %v430_v42, %v446_v45  ;;  %637 = vrot.lane.b32.xlu1 %v344_v34, %s2548_s16 }
 0x191   : > { %v379_v54 = vcombine.low %v355_v48, %v371_v46  ;;  %v380_v55 = vcombine.high %v355_v48, %v371_v46  ;;  %v395_v56 = vcombine.low %v362_v49, %v378_v47  ;;  %v396_v57 = vcombine.high %v362_v49, %v378_v47 }
 0x192   : > { %v455_v58 = vrot.slane %v447_v50, %v2701_v40  ;;  %v462_v59 = vrot.slane %v448_v51, %v2701_v40  ;;  %v471_v60 = vrot.slane %v463_v52, %v2701_v40  ;;  %v478_v61 = vrot.slane %v464_v53, %v2701_v40  ;;  %v624_v52 = vpop.permute.xlu0 %623  ;;  %v626_v53 = vpop.permute.xlu1 %625 }
 0x193   : > { %v387_v62 = vrot.slane %v379_v54, %v2701_v40  ;;  %v394_v63 = vrot.slane %v380_v55, %v2701_v40  ;;  %v403_v0 = vrot.slane %v395_v56, %v2701_v40  ;;  %v410_v1 = vrot.slane %v396_v57, %v2701_v40 }
 0x194   : > { %v551_v2 = vcombine.low %v455_v58, %v462_v59  ;;  %v2204_v3 = vcombine.high %v455_v58, %v462_v59  ;;  %v567_v4 = vcombine.low %v471_v60, %v478_v61  ;;  %v2205_v5 = vcombine.high %v471_v60, %v478_v61 }
 0x195   : > { %v483_v6 = vcombine.low %v387_v62, %v394_v63  ;;  %v2202_v7 = vcombine.high %v387_v62, %v394_v63  ;;  %v499_v8 = vcombine.low %v403_v0, %v410_v1  ;;  %v2203_v9 = vcombine.high %v403_v0, %v410_v1 }
 0x196   : > { %v558_v10 = vrot.slane %v551_v2, %v2698_v33  ;;  %v566_v11 = vrot.slane %v2204_v3, %v2698_v33  ;;  %v574_v12 = vrot.slane %v567_v4, %v2698_v33  ;;  %v582_v13 = vrot.slane %v2205_v5, %v2698_v33 }
 0x197   : > { %v490_v15 = vrot.slane %v483_v6, %v2698_v33  ;;  %v498_v17 = vrot.slane %v2202_v7, %v2698_v33  ;;  %v506_v19 = vrot.slane %v499_v8, %v2698_v33  ;;  %v514_v20 = vrot.slane %v2203_v9, %v2698_v33 }
 0x198   : > { %v584_v21 = vcombine.high %v558_v10, %v566_v11  ;;  %v600_v22 = vcombine.high %v574_v12, %v582_v13  ;;  %v583_v27 = vcombine.low %v558_v10, %v566_v11  ;;  %v599_v28 = vcombine.low %v574_v12, %v582_v13 }
 0x199   : > { %v516_v23 = vcombine.high %v490_v15, %v498_v17  ;;  %v532_v24 = vcombine.high %v506_v19, %v514_v20  ;;  %v515_v25 = vcombine.low %v490_v15, %v498_v17  ;;  %v531_v26 = vcombine.low %v506_v19, %v514_v20 }
 0x19a   : > { %v598_v29 = vrot.slane %v584_v21, %v2701_v40  ;;  %v614_v34 = vrot.slane %v600_v22, %v2701_v40  ;;  %v591_v36 = vrot.slane %v583_v27, %v2701_v40  ;;  %v607_v37 = vrot.slane %v599_v28, %v2701_v40 }
 0x19b   : > { %v523_v30 = vrot.slane %v515_v25, %v2701_v40  ;;  %v530_v31 = vrot.slane %v516_v23, %v2701_v40  ;;  %v546_v32 = vrot.slane %v532_v24, %v2701_v40  ;;  %v539_v35 = vrot.slane %v531_v26, %v2701_v40 }
 0x19c   : > { %v617_v39 = vcombine.low %v598_v29, %v614_v34  ;;  %v618_v42 = vcombine.high %v598_v29, %v614_v34  ;;  %v615_v46 = vcombine.low %v591_v36, %v607_v37  ;;  %v616_v47 = vcombine.high %v591_v36, %v607_v37 }
 0x19d   : > { %v549_v38 = vcombine.low %v530_v31, %v546_v32  ;;  %v550_v41 = vcombine.high %v530_v31, %v546_v32  ;;  %v547_v44 = vcombine.low %v523_v30, %v539_v35  ;;  %v548_v45 = vcombine.high %v523_v30, %v539_v35 }
 0x19f   : > { %v2743_v48 = vpack.c.bf16 %v617_v39, %v549_v38  ;;  %v2745_v49 = vpack.c.bf16 %v618_v42, %v550_v41  ;;  %v2747_v50 = vpack.c.bf16 %v615_v46, %v547_v44  ;;  %v2749_v51 = vpack.c.bf16 %v616_v47, %v548_v45 }
 0x1f6   : > { %v628_v54 = vpop.permute.xlu0 %627 }
 0x1fa   : > { %v630_v55 = vpop.permute.xlu1 %629  ;;  %v632_v56 = vpop.permute.xlu0 %631 }
 0x1fb   : > { %v647_v57 = vcombine.low %v624_v52, %v632_v56  ;;  %v648_v58 = vcombine.high %v624_v52, %v632_v56 }
 0x1fd   : > { %v655_v1 = vrot.slane %v647_v57, %v2698_v33  ;;  %v662_v2 = vrot.slane %v648_v58, %v2698_v33 }
 0x1fe   : > { %v634_v59 = vpop.permute.xlu1 %633 }
 0x1ff   : > { %v636_v60 = vpop.permute.xlu0 %635  ;;  %v715_v63 = vcombine.low %v626_v53, %v634_v59  ;;  %v716_v0 = vcombine.high %v626_v53, %v634_v59 }
 0x200   : > { %v663_v61 = vcombine.low %v628_v54, %v636_v60  ;;  %v664_v62 = vcombine.high %v628_v54, %v636_v60 }
 0x201   : > { %v723_v12 = vrot.slane %v715_v63, %v2698_v33  ;;  %v730_v13 = vrot.slane %v716_v0, %v2698_v33 }
 0x202   : > { %v671_v3 = vrot.slane %v663_v61, %v2698_v33  ;;  %v678_v4 = vrot.slane %v664_v62, %v2698_v33  ;;  %v638_v5 = vpop.permute.xlu1 %637 }
 0x203   : > { %v731_v6 = vcombine.low %v630_v55, %v638_v5  ;;  %v732_v7 = vcombine.high %v630_v55, %v638_v5 }
 0x204   : > { %v679_v8 = vcombine.low %v655_v1, %v671_v3  ;;  %v680_v9 = vcombine.high %v655_v1, %v671_v3  ;;  %v695_v10 = vcombine.low %v662_v2, %v678_v4  ;;  %v696_v11 = vcombine.high %v662_v2, %v678_v4 }
 0x205   : > { %v739_v15 = vrot.slane %v731_v6, %v2698_v33  ;;  %v746_v17 = vrot.slane %v732_v7, %v2698_v33 }
 0x206   : > { %v687_v19 = vrot.slane %v679_v8, %v2701_v40  ;;  %v694_v20 = vrot.slane %v680_v9, %v2701_v40  ;;  %v703_v21 = vrot.slane %v695_v10, %v2701_v40  ;;  %v710_v22 = vrot.slane %v696_v11, %v2701_v40 }
 0x207   : > { %v747_v23 = vcombine.low %v723_v12, %v739_v15  ;;  %v748_v24 = vcombine.high %v723_v12, %v739_v15  ;;  %v763_v25 = vcombine.low %v730_v13, %v746_v17  ;;  %v764_v26 = vcombine.high %v730_v13, %v746_v17 }
 0x208   : > { %v783_v27 = vcombine.low %v687_v19, %v694_v20  ;;  %v2206_v28 = vcombine.high %v687_v19, %v694_v20  ;;  %v799_v29 = vcombine.low %v703_v21, %v710_v22  ;;  %v2207_v30 = vcombine.high %v703_v21, %v710_v22 }
 0x209   : > { %v755_v31 = vrot.slane %v747_v23, %v2701_v40  ;;  %v762_v32 = vrot.slane %v748_v24, %v2701_v40  ;;  %v771_v34 = vrot.slane %v763_v25, %v2701_v40  ;;  %v778_v35 = vrot.slane %v764_v26, %v2701_v40 }
 0x20a   : > { %v790_v36 = vrot.slane %v783_v27, %v2698_v33  ;;  %v798_v37 = vrot.slane %v2206_v28, %v2698_v33  ;;  %v806_v38 = vrot.slane %v799_v29, %v2698_v33  ;;  %v814_v39 = vrot.slane %v2207_v30, %v2698_v33 }
 0x20b   : > { %v851_v41 = vcombine.low %v755_v31, %v762_v32  ;;  %v2208_v42 = vcombine.high %v755_v31, %v762_v32  ;;  %v867_v44 = vcombine.low %v771_v34, %v778_v35  ;;  %v2209_v45 = vcombine.high %v771_v34, %v778_v35 }
 0x20c   : > { %v815_v46 = vcombine.low %v790_v36, %v798_v37  ;;  %v831_v47 = vcombine.low %v806_v38, %v814_v39  ;;  %v816_v0 = vcombine.high %v790_v36, %v798_v37  ;;  %v832_v1 = vcombine.high %v806_v38, %v814_v39 }
 0x20d   : > { %v858_v52 = vrot.slane %v851_v41, %v2698_v33  ;;  %v866_v53 = vrot.slane %v2208_v42, %v2698_v33  ;;  %v874_v54 = vrot.slane %v867_v44, %v2698_v33  ;;  %v882_v55 = vrot.slane %v2209_v45, %v2698_v33 }
 0x20e   : > { %v823_v56 = vrot.slane %v815_v46, %v2701_v40  ;;  %v839_v57 = vrot.slane %v831_v47, %v2701_v40  ;;  %v830_v10 = vrot.slane %v816_v0, %v2701_v40  ;;  %v846_v11 = vrot.slane %v832_v1, %v2701_v40 }
 0x20f   : > { %v883_v58 = vcombine.low %v858_v52, %v866_v53  ;;  %v899_v59 = vcombine.low %v874_v54, %v882_v55  ;;  %v884_v60 = vcombine.high %v858_v52, %v866_v53  ;;  %v900_v61 = vcombine.high %v874_v54, %v882_v55 }
 0x210   : > { %v847_v2 = vcombine.low %v823_v56, %v839_v57  ;;  %v848_v3 = vcombine.high %v823_v56, %v839_v57  ;;  %v849_v19 = vcombine.low %v830_v10, %v846_v11  ;;  %v850_v20 = vcombine.high %v830_v10, %v846_v11 }
 0x211   : > { %v891_v62 = vrot.slane %v883_v58, %v2701_v40  ;;  %v907_v63 = vrot.slane %v899_v59, %v2701_v40  ;;  %v898_v6 = vrot.slane %v884_v60, %v2701_v40  ;;  %v914_v7 = vrot.slane %v900_v61, %v2701_v40 }
 0x213   : > { %v915_v4 = vcombine.low %v891_v62, %v907_v63  ;;  %v916_v5 = vcombine.high %v891_v62, %v907_v63  ;;  %v917_v15 = vcombine.low %v898_v6, %v914_v7  ;;  %v918_v17 = vcombine.high %v898_v6, %v914_v7 }
 0x215   : > { %v919_v8 = vpack.c.bf16 %v915_v4, %v847_v2  ;;  %v920_v9 = vpack.c.bf16 %v916_v5, %v848_v3  ;;  %v921_v21 = vpack.c.bf16 %v917_v15, %v849_v19  ;;  %v922_v22 = vpack.c.bf16 %v918_v17, %v850_v20 }
 0x217   : > { %v1224_v12 = vsel %vm1219_vm3, %v919_v8, 0  ;;  %v1271_v13 = vsel %vm1219_vm3, %v920_v9, 0  ;;  %v1318_v23 = vsel %vm1219_vm3, %v921_v21, 0  ;;  %v1365_v24 = vsel %vm1219_vm3, %v922_v22, 0 }
 0x218   : > { %2261 = vmatpush3.bf16.xpose.msra.mxu1 %v1224_v12  ;;  %2267 = vmatpush3.bf16.xpose.msra.mxu0 %v1271_v13 }
 0x219   : > { %2272 = vmatprep.subr.bf16.mxu1 %v2551_v43  ;;  %2278 = vmatprep.subr.bf16.mxu0 %v2551_v43 }
 0x21f   : > { %2263 = vmatmul.mubr.msk.bf16.vlgmr.msra.gmra.mrb[0].mxu1 %vm1219_vm3, %v2747_v50  ;;  %2269 = vmatmul.mubr.msk.bf16.vlgmr.msra.gmra.mrb[4].mxu0 %vm1219_vm3, %v2749_v51 }
 0x220   : > { %2273 = vmatpush3.bf16.xpose.msra.mxu1 %v1318_v23  ;;  %2279 = vmatpush3.bf16.xpose.msra.mxu0 %v1365_v24 }
 0x221   : > { %2274 = vmatprep.mubr.msk.bf16.mxu1 %vm2552_vm2, %v2551_v43  ;;  %2280 = vmatprep.mubr.msk.bf16.mxu0 %vm2552_vm2, %v2551_v43 }
 0x222   : > { %2284 = vmatprep.subr.bf16.mxu1 %v2551_v43  ;;  %2290 = vmatprep.subr.bf16.mxu0 %v2551_v43 }
 0x227   : > { %2275 = vmatmul.mubr.msk.bf16.vlgmr.msra.gmra.mrb[4].mxu1 %vm1219_vm3, %v2743_v48  ;;  %2281 = vmatmul.mubr.msk.bf16.vlgmr.msra.gmra.mrb[8].mxu0 %vm1219_vm3, %v2745_v49 }
 0x228   : > { %2286 = vmatprep.mubr.msk.bf16.mxu1 %vm2552_vm2, %v2551_v43  ;;  %2292 = vmatprep.mubr.msk.bf16.mxu0 %vm2552_vm2, %v2551_v43 }
 0x2f2   : > { %v1260_v50 = vpop.f32.mrb[0].mxu1  ;;  %v1307_v51 = vpop.f32.mrb[4].mxu0 }
 0x2f3   : > { %v1408_v25 = vmul.f32 0.25, %v1260_v50  ;;  %v1410_v26 = vmul.f32 0.25, %v1307_v51  ;;  %v2264_v27 = vpop.f32.mrb[1].mxu1  ;;  %v2270_v28 = vpop.f32.mrb[5].mxu0 }
 0x2f4   : > { %v1263_v29 = vpop.f32.mrb[2].mxu1  ;;  %v1310_v30 = vpop.f32.mrb[6].mxu0 }
 0x2f5   : > { %v1409_v31 = vmul.f32 0.25, %v1263_v29  ;;  %v1411_v32 = vmul.f32 0.25, %v1310_v30  ;;  %v2265_v48 = vpop.f32.mrb[3].mxu1  ;;  %v2271_v34 = vpop.f32.mrb[7].mxu0  ;;  %v1425_v49 = vadd.f32 %v2680_v14, %v1408_v25  ;;  %v1427_v35 = vadd.f32 %v2680_v14, %v1410_v26 }
 0x2f7   : > { %v1433_v36 = vsel %vm1219_vm3, %v1425_v49, -inf  ;;  %v1426_v37 = vadd.f32 %v2680_v14, %v1409_v31  ;;  %v1428_v38 = vadd.f32 %v2680_v14, %v1411_v32  ;;  %v1439_v52 = vsel %vm1219_vm3, %v1427_v35, -inf }
 0x2f8   : > { %1434 = vmax.xlane.f32.xlu0 %v1433_v36 }
 0x2f9   : > { %v1436_v39 = vsel %vm1219_vm3, %v1426_v37, -inf  ;;  %v1442_v62 = vsel %vm1219_vm3, %v1428_v38, -inf }
 0x2fa   : > { %1437 = vmax.xlane.f32.xlu1 %v1436_v39  ;;  %v1354_v41 = vpop.f32.mrb[4].mxu1  ;;  %v1401_v42 = vpop.f32.mrb[8].mxu0 }
 0x2fb   : > { %v1412_v44 = vmul.f32 0.25, %v1354_v41  ;;  %v1414_v45 = vmul.f32 0.25, %v1401_v42  ;;  %v2276_v46 = vpop.f32.mrb[5].mxu1  ;;  %v2282_v47 = vpop.f32.mrb[9].mxu0 }
 0x2fc   : > { %v1357_v53 = vpop.f32.mrb[6].mxu1  ;;  %1440 = vmax.xlane.f32.xlu0 %v1439_v52  ;;  %v1404_v54 = vpop.f32.mrb[10].mxu0 }
 0x2fd   : > { %v1413_v55 = vmul.f32 0.25, %v1357_v53  ;;  %v1415_v56 = vmul.f32 0.25, %v1404_v54  ;;  %v2277_v57 = vpop.f32.mrb[7].mxu1  ;;  %v2283_v58 = vpop.f32.mrb[11].mxu0  ;;  %v1429_v59 = vadd.f32 %v2680_v14, %v1412_v44  ;;  %v1431_v60 = vadd.f32 %v2680_v14, %v1414_v45 }
 0x2ff   : > { %v1445_v61 = vsel %vm1219_vm3, %v1429_v59, -inf  ;;  %v2819_v63 = vadd.f32 %v2680_v14, %v1413_v55  ;;  %v1432_v0 = vadd.f32 %v2680_v14, %v1415_v56  ;;  %v1451_v2 = vsel %vm1219_vm3, %v1431_v60, -inf }
 0x300   : > { %1446 = vmax.xlane.f32.xlu1 %v1445_v61  ;;  %1443 = vmax.xlane.f32.xlu0 %v1442_v62 }
 0x301   : > { %v1448_v1 = vsel %vm1219_vm3, %v2819_v63, -inf  ;;  %v1454_v3 = vsel %vm1219_vm3, %v1432_v0, -inf }
 0x304   : > { %1449 = vmax.xlane.f32.xlu0 %v1448_v1  ;;  %1452 = vmax.xlane.f32.xlu1 %v1451_v2 }
 0x308   : > { %1455 = vmax.xlane.f32.xlu0 %v1454_v3 }
 0x315   : > { %925 = vrot.lane.b32.xlu1 %v2685_v16, %s2546_s14 }
 0x319   : > { %931 = vrot.lane.b32.xlu1 %v2685_v16, %s2545_s13 }
 0x31d   : > { %933 = vrot.lane.b32.xlu1 %v2687_v18, %s2545_s13  ;;  %s2194_s13 = sshll.u32 %s241_s12, 4 }
 0x31e   : > { %927 = vrot.lane.b32.xlu0 %v2687_v18, %s2546_s14  ;;  %s243_s16 = scalar_lea.vmem [#allocation5], %s2194_s13 }
 0x31f   : > { %s2105_s17 = sshll.u32 %s243_s16, 4  ;;  %s2987_s17 = int_to_ptr.vmem [resolvable:$true] %s2105_s17 }
 0x320   : > { %s2472_s8 = scalar_lea.vmem %s2987_s17, 256  ;;  %p2479_p2 = scmp.lt.s32.totalorder %s2987_s17, %s2477_s10 }
 0x321   : > { %p2473_p6 = scmp.ne.s32.totalorder %s2987_s17, %s2472_s8 }
 0x322   : > { %937 = vrot.lane.b32.xlu0 %v2685_v16, %s2547_s15 }
 0x323   : > { %p2474_p10 = pnand %p2473_p6, %p3053_p9 }
 0x325   : > { %p2475_p12 = pneg %p2474_p10 }
 0x385   : > { %v1435_v14 = vpop.xlane.xlu0 %1434 }
 0x386   : > { %v1457_v4 = vsub.f32 %v1425_v49, %v1435_v14 }
 0x387   : > { %v1438_v5 = vpop.xlane.xlu1 %1437 }
 0x388   : > { %v1465_v6 = vmul.f32 1.442695, %v1457_v4  ;;  %v1458_v7 = vsub.f32 %v1426_v37, %v1438_v5 }
 0x389   : > { %v1441_v8 = vpop.xlane.xlu0 %1440 }
 0x38a   : > { %2412 = vpow2.f32 %v1465_v6  ;;  %v1467_v9 = vmul.f32 1.442695, %v1458_v7  ;;  %v1459_v10 = vsub.f32 %v1427_v35, %v1441_v8 }
 0x38c   : > { %2414 = vpow2.f32 %v1467_v9  ;;  %v1469_v11 = vmul.f32 1.442695, %v1459_v10 }
 0x38d   : > { %v1447_v12 = vpop.xlane.xlu1 %1446  ;;  %v1444_v13 = vpop.xlane.xlu0 %1443 }
 0x38e   : > { %2416 = vpow2.f32 %v1469_v11  ;;  %v1461_v15 = vsub.f32 %v1429_v59, %v1447_v12  ;;  %v1460_v17 = vsub.f32 %v1428_v38, %v1444_v13 }
 0x390   : > { %v1471_v19 = vmul.f32 1.442695, %v1460_v17  ;;  %v1473_v22 = vmul.f32 1.442695, %v1461_v15 }
 0x391   : > { %v1450_v20 = vpop.xlane.xlu0 %1449  ;;  %v1453_v21 = vpop.xlane.xlu1 %1452 }
 0x392   : > { %v1463_v23 = vsub.f32 %v1431_v60, %v1453_v21  ;;  %2418 = vpow2.f32 %v1471_v19  ;;  %v1462_v39 = vsub.f32 %v2819_v63, %v1450_v20 }
 0x393   : > { %2420 = vpow2.f32 %v1473_v22 }
 0x394   : > { %v2836_v24 = vpop.eup %2412  ;;  %v1477_v26 = vmul.f32 1.442695, %v1463_v23  ;;  %v1475_v41 = vmul.f32 1.442695, %v1462_v39 }
 0x395   : > { %v1456_v50 = vpop.xlane.xlu0 %1455  ;;  %v1481_v51 = vsel %vm1219_vm3, %v2836_v24, 0.0  ;;  %v926_v46 = vpop.permute.xlu1 %925 }
 0x396   : > { %v2840_v25 = vpop.eup %2414  ;;  %v1464_v27 = vsub.f32 %v1432_v0, %v1456_v50  ;;  %1482 = vadd.xlane.f32.xlu1 %v1481_v51  ;;  %2422 = vpow2.f32 %v1477_v26 }
 0x397   : > { %v1484_v28 = vsel %vm1219_vm3, %v2840_v25, 0.0 }
 0x398   : > { %v2844_v29 = vpop.eup %2416  ;;  %1485 = vadd.xlane.f32.xlu0 %v1484_v28  ;;  %v1479_v31 = vmul.f32 1.442695, %v1464_v27 }
 0x399   : > { %v1487_v30 = vsel %vm1219_vm3, %v2844_v29, 0.0  ;;  %v928_v45 = vpop.permute.xlu0 %927  ;;  %v932_v52 = vpop.permute.xlu1 %931 }
 0x39a   : > { %1488 = vadd.xlane.f32.xlu1 %v1487_v30  ;;  %2424 = vpow2.f32 %v1479_v31  ;;  %v943_v55 = vcombine.low %v2685_v16, %v932_v52  ;;  %v944_v56 = vcombine.high %v2685_v16, %v932_v52 }
 0x39b   : > { %2426 = vpow2.f32 %v1475_v41 }
 0x39c   : > { %v2848_v32 = vpop.eup %2418  ;;  %v951_v60 = vrot.slane %v943_v55, %v2698_v33  ;;  %v958_v61 = vrot.slane %v944_v56, %v2698_v33 }
 0x39d   : > { %v1490_v48 = vsel %vm1219_vm3, %v2848_v32, 0.0  ;;  %v2852_v34 = vpop.eup %2420  ;;  %v938_v47 = vpop.permute.xlu0 %937 }
 0x39e   : > { %1491 = vadd.xlane.f32.xlu0 %v1490_v48  ;;  %v1493_v49 = vsel %vm1219_vm3, %v2852_v34, 0.0  ;;  %v959_v53 = vcombine.low %v926_v46, %v938_v47  ;;  %v960_v54 = vcombine.high %v926_v46, %v938_v47  ;;  %v934_v58 = vpop.permute.xlu1 %933 }
 0x39f   : > { %v1011_v6 = vcombine.low %v2687_v18, %v934_v58  ;;  %v1012_v7 = vcombine.high %v2687_v18, %v934_v58 }
 0x3a0   : > { %v2856_v35 = vpop.eup %2422  ;;  %v967_v57 = vrot.slane %v959_v53, %v2698_v33  ;;  %v974_v59 = vrot.slane %v960_v54, %v2698_v33 }
 0x3a1   : > { %v1499_v36 = vsel %vm1219_vm3, %v2856_v35, 0.0  ;;  %v1019_v19 = vrot.slane %v1011_v6, %v2698_v33  ;;  %v1026_v20 = vrot.slane %v1012_v7, %v2698_v33 }
 0x3a2   : > { %1494 = vadd.xlane.f32.xlu0 %v1493_v49  ;;  %v975_v62 = vcombine.low %v951_v60, %v967_v57  ;;  %v976_v63 = vcombine.high %v951_v60, %v967_v57  ;;  %v991_v0 = vcombine.low %v958_v61, %v974_v59  ;;  %v992_v1 = vcombine.high %v958_v61, %v974_v59 }
 0x3a4   : > { %v2860_v37 = vpop.eup %2424  ;;  %v983_v3 = vrot.slane %v975_v62, %v2701_v40  ;;  %v990_v14 = vrot.slane %v976_v63, %v2701_v40  ;;  %v999_v16 = vrot.slane %v991_v0, %v2701_v40  ;;  %v1006_v4 = vrot.slane %v992_v1, %v2701_v40 }
 0x3a5   : > { %v1502_v38 = vsel %vm1219_vm3, %v2860_v37, 0.0  ;;  %v2867_v42 = vpop.eup %2426 }
 0x3a6   : > { %1500 = vadd.xlane.f32.xlu0 %v1499_v36  ;;  %v1496_v44 = vsel %vm1219_vm3, %v2867_v42, 0.0  ;;  %v1079_v9 = vcombine.low %v983_v3, %v990_v14  ;;  %v2210_v10 = vcombine.high %v983_v3, %v990_v14  ;;  %v1095_v11 = vcombine.low %v999_v16, %v1006_v4 }
 0x3a7   : > { %v2211_v12 = vcombine.high %v999_v16, %v1006_v4 }
 0x3a8   : > { %v1086_v22 = vrot.slane %v1079_v9, %v2698_v33  ;;  %v1094_v50 = vrot.slane %v2210_v10, %v2698_v33  ;;  %v1102_v51 = vrot.slane %v1095_v11, %v2698_v33 }
 0x3a9   : > { %v1110_v26 = vrot.slane %v2211_v12, %v2698_v33 }
 0x3aa   : > { %1503 = vadd.xlane.f32.xlu0 %v1502_v38  ;;  %v1111_v41 = vcombine.low %v1086_v22, %v1094_v50 }
 0x3ab   : > { %939 = vrot.lane.b32.xlu1 %v2687_v18, %s2547_s15  ;;  %v1128_v46 = vcombine.high %v1102_v51, %v1110_v26 }
 0x3ac   : > { %v1119_v61 = vrot.slane %v1111_v41, %v2701_v40 }
 0x3ad   : > { %v1142_v0 = vrot.slane %v1128_v46, %v2701_v40 }
 0x3cf   : > { %1497 = vadd.xlane.f32.xlu1 %v1496_v44  ;;  %v1127_v44 = vcombine.low %v1102_v51, %v1110_v26 }
 0x3d1   : > { %v1135_v62 = vrot.slane %v1127_v44, %v2701_v40 }
 0x3d3   : > { %v1143_v10 = vcombine.low %v1119_v61, %v1135_v62  ;;  %v1144_v11 = vcombine.high %v1119_v61, %v1135_v62 }
 0x423   : > { %v1483_v2 = vpop.xlane.xlu1 %1482 }
 0x424   : > { %2428 = vrcp.f32 %v1483_v2 }
 0x425   : > { %v1486_v8 = vpop.xlane.xlu0 %1485 }
 0x426   : > { %2430 = vrcp.f32 %v1486_v8 }
 0x427   : > { %v1489_v5 = vpop.xlane.xlu1 %1488 }
 0x42b   : > { %v940_v13 = vpop.permute.xlu1 %939  ;;  %v1492_v21 = vpop.xlane.xlu0 %1491 }
 0x42c   : > { %v1027_v15 = vcombine.low %v928_v45, %v940_v13  ;;  %v1028_v17 = vcombine.high %v928_v45, %v940_v13  ;;  %2432 = vrcp.f32 %v1492_v21  ;;  %v1112_v45 = vcombine.high %v1086_v22, %v1094_v50 }
 0x42d   : > { %2434 = vrcp.f32 %v1489_v5 }
 0x42e   : > { %v1035_v23 = vrot.slane %v1027_v15, %v2698_v33  ;;  %v1042_v18 = vrot.slane %v1028_v17, %v2698_v33  ;;  %v2429_v60 = vpop.eup %2428  ;;  %v1126_v63 = vrot.slane %v1112_v45, %v2701_v40 }
 0x42f   : > { %v2891_v48 = vpop.xlane.xlu0 %1494  ;;  %v1513_v51 = vmul.f32 %v2429_v60, %v2836_v24 }
 0x430   : > { %v1043_v27 = vcombine.low %v1019_v19, %v1035_v23  ;;  %v1044_v28 = vcombine.high %v1019_v19, %v1035_v23  ;;  %v1059_v30 = vcombine.low %v1026_v20, %v1042_v18  ;;  %v1060_v31 = vcombine.high %v1026_v20, %v1042_v18  ;;  %v2431_v1 = vpop.eup %2430 }
 0x431   : > { %v1145_v17 = vcombine.low %v1126_v63, %v1142_v0  ;;  %v1146_v19 = vcombine.high %v1126_v63, %v1142_v0  ;;  %v1514_v20 = vmul.f32 %v2431_v1, %v2840_v25 }
 0x432   : > { %v1051_v49 = vrot.slane %v1043_v27, %v2701_v40  ;;  %v1058_v36 = vrot.slane %v1044_v28, %v2701_v40  ;;  %v1067_v38 = vrot.slane %v1059_v30, %v2701_v40  ;;  %v1074_v39 = vrot.slane %v1060_v31, %v2701_v40 }
 0x433   : > { %v1501_v55 = vpop.xlane.xlu0 %1500  ;;  %v1521_v30 = vpack.c.bf16 %v1514_v20, %v1513_v51 }
 0x434   : > { %v1147_v47 = vcombine.low %v1051_v49, %v1058_v36  ;;  %v2212_v52 = vcombine.high %v1051_v49, %v1058_v36  ;;  %v1163_v53 = vcombine.low %v1067_v38, %v1074_v39  ;;  %v2213_v54 = vcombine.high %v1067_v38, %v1074_v39 }
 0x435   : > { %2436 = vrcp.f32 %v1501_v55 }
 0x436   : > { %v1154_v56 = vrot.slane %v1147_v47, %v2698_v33  ;;  %v1162_v57 = vrot.slane %v2212_v52, %v2698_v33  ;;  %v1170_v58 = vrot.slane %v1163_v53, %v2698_v33  ;;  %v1178_v59 = vrot.slane %v2213_v54, %v2698_v33  ;;  %v2433_v4 = vpop.eup %2432 }
 0x437   : > { %v1504_v5 = vpop.xlane.xlu0 %1503  ;;  %v2435_v9 = vpop.eup %2434  ;;  %v1516_v21 = vmul.f32 %v2433_v4, %v2848_v32 }
 0x438   : > { %v1179_v2 = vcombine.low %v1154_v56, %v1162_v57  ;;  %v1195_v3 = vcombine.low %v1170_v58, %v1178_v59  ;;  %v1180_v14 = vcombine.high %v1154_v56, %v1162_v57  ;;  %v1196_v16 = vcombine.high %v1170_v58, %v1178_v59 }
 0x439   : > { %2438 = vrcp.f32 %v1504_v5  ;;  %v1515_v26 = vmul.f32 %v2435_v9, %v2844_v29 }
 0x43a   : > { %v1187_v6 = vrot.slane %v1179_v2, %v2701_v40  ;;  %v1203_v7 = vrot.slane %v1195_v3, %v2701_v40  ;;  %v1194_v8 = vrot.slane %v1180_v14, %v2701_v40  ;;  %v1210_v12 = vrot.slane %v1196_v16, %v2701_v40 }
 0x43b   : > { %v1522_v31 = vpack.c.bf16 %v1516_v21, %v1515_v26  ;;  %2440 = vrcp.f32 %v2891_v48  ;;  %v2409_v48 = vld [vmem:[%s3040_s3 + $0x8] sm:$0xff]  }
 0x43c   : > { %v1211_v13 = vcombine.low %v1187_v6, %v1203_v7  ;;  %v1212_v15 = vcombine.high %v1187_v6, %v1203_v7  ;;  %v1213_v22 = vcombine.low %v1194_v8, %v1210_v12  ;;  %v1214_v23 = vcombine.high %v1194_v8, %v1210_v12 }
 0x43e   : > { %v1215_v18 = vpack.c.bf16 %v1211_v13, %v1143_v10  ;;  %v1216_v50 = vpack.c.bf16 %v1212_v15, %v1144_v11  ;;  %v1217_v27 = vpack.c.bf16 %v1213_v22, %v1145_v17  ;;  %v1218_v28 = vpack.c.bf16 %v1214_v23, %v1146_v19 }
 0x43f   : > { %v2437_v25 = vpop.eup %2436 }
 0x440   : > { %2285 = vmatpush3.bf16.msra.mxu1 %v1215_v18  ;;  %2291 = vmatpush3.bf16.msra.mxu0 %v1216_v50  ;;  %v1519_v29 = vmul.f32 %v2437_v25, %v2856_v35  ;;  %v2408_v35 = vld [vmem:[%s3040_s3] sm:$0xff]  }
 0x441   : > { %2296 = vmatprep.subr.bf16.mxu1 %v2551_v43  ;;  %2302 = vmatprep.subr.bf16.mxu0 %v2551_v43 }
 0x443   : > { %2287 = vmatmul.mubr.msk.bf16.vlgmr.msra.gmra.mrb[8].mxu1 %vm1219_vm3, %v1521_v30  ;;  %2293 = vmatmul.mubr.msk.bf16.vlgmr.msra.gmra.mrb[12].mxu0 %vm1219_vm3, %v1522_v31  ;;  %v2439_v32 = vpop.eup %2438 }
 0x444   : > { %2297 = vmatpush3.bf16.msra.mxu1 %v1217_v27  ;;  %2303 = vmatpush3.bf16.msra.mxu0 %v1218_v28  ;;  %v1520_v24 = vmul.f32 %v2439_v32, %v2860_v37 }
 0x445   : > { %2304 = vmatprep.mubr.msk.bf16.mxu0 %vm2552_vm2, %v2551_v43  ;;  %2298 = vmatprep.mubr.msk.bf16.mxu1 %vm2552_vm2, %v2551_v43  ;;  %v2441_v38 = vpop.eup %2440 }
 0x446   : > { %2308 = vmatprep.subr.bf16.mxu1 %v2551_v43  ;;  %v1524_v49 = vpack.c.bf16 %v1520_v24, %v1519_v29  ;;  %v1517_v37 = vmul.f32 %v2441_v38, %v2852_v34 }
 0x44b   : > { %2305 = vmatmul.mubr.msk.bf16.vlgmr.msra.gmra.mrb[16].mxu0 %vm1219_vm3, %v1524_v49 }
 0x45c   : > { %v1498_v36 = vpop.xlane.xlu1 %1497 }
 0x45d   : > { %2442 = vrcp.f32 %v1498_v36 }
 0x467   : > { %v2443_v39 = vpop.eup %2442 }
 0x468   : > { %v1518_v41 = vmul.f32 %v2443_v39, %v2867_v42 }
 0x46a   : > { %v1523_v44 = vpack.c.bf16 %v1518_v41, %v1517_v37 }
 0x46c   : > { %2299 = vmatmul.mubr.msk.bf16.vlgmr.msra.gmra.mrb[12].mxu1 %vm1219_vm3, %v1523_v44 }
 0x46d   : > { %2316 = vmatprep.mubr.msk.bf16.mxu1 %vm2552_vm2, %v2551_v43  ;;  %2309 = vmatpush3.bf16.msra.mxu1 %v2408_v35 }
 0x46e   : > { %2310 = vmatprep.subr.bf16.mxu1 %v2551_v43 }
 0x471   : > { %2311 = vmatpush3.bf16.msra.mxu1 %v2409_v48 }
 0x472   : > { %2312 = vmatprep.subr.bf16.mxu1 %v2551_v43 }
 0x516   : > { %v1562_v34 = vpop.f32.mrb[8].mxu1  ;;  %v1606_v42 = vpop.f32.mrb[12].mxu0 }
 0x517   : > { %v2288_v45 = vpop.f32.mrb[9].mxu1  ;;  %v2294_v46 = vpop.f32.mrb[13].mxu0 }
 0x518   : > { %v1565_v47 = vpop.f32.mrb[10].mxu1  ;;  %v1609_v52 = vpop.f32.mrb[14].mxu0  ;;  %v2410_v46 = vld [vmem:[%s3040_s3 + $0x10] sm:$0xff]  }
 0x519   : > { %v2289_v53 = vpop.f32.mrb[11].mxu1  ;;  %v2295_v54 = vpop.f32.mrb[15].mxu0  ;;  %2313 = vmatpush3.bf16.msra.mxu1 %v2410_v46 }
 0x51a   : > { %2314 = vmatprep.subr.bf16.mxu1 %v2551_v43 }
 0x51e   : > { %v1694_v55 = vpop.f32.mrb[16].mxu0 }
 0x51f   : > { %v1717_v56 = vcombine.low %v1606_v42, %v1694_v55  ;;  %v1718_v57 = vcombine.high %v1606_v42, %v1694_v55  ;;  %v2306_v58 = vpop.f32.mrb[17].mxu0 }
 0x520   : > { %v1697_v59 = vpop.f32.mrb[18].mxu0 }
 0x521   : > { %v1785_v60 = vcombine.low %v1609_v52, %v1697_v59  ;;  %v1786_v61 = vcombine.high %v1609_v52, %v1697_v59  ;;  %v2307_v62 = vpop.f32.mrb[19].mxu0  ;;  %v1725_v3 = vrot.slane %v1717_v56, %v2698_v33  ;;  %v1732_v14 = vrot.slane %v1718_v57, %v2698_v33 }
 0x523   : > { %v1793_v13 = vrot.slane %v1785_v60, %v2698_v33  ;;  %v1800_v15 = vrot.slane %v1786_v61, %v2698_v33 }
 0x53f   : > { %v1650_v63 = vpop.f32.mrb[12].mxu1 }
 0x540   : > { %v1701_v0 = vcombine.low %v1562_v34, %v1650_v63  ;;  %v1702_v1 = vcombine.high %v1562_v34, %v1650_v63  ;;  %v2300_v2 = vpop.f32.mrb[13].mxu1 }
 0x541   : > { %v1653_v16 = vpop.f32.mrb[14].mxu1 }
 0x542   : > { %v1709_v4 = vrot.slane %v1701_v0, %v2698_v33  ;;  %v1716_v5 = vrot.slane %v1702_v1, %v2698_v33  ;;  %v1769_v6 = vcombine.low %v1565_v47, %v1653_v16  ;;  %v1770_v7 = vcombine.high %v1565_v47, %v1653_v16  ;;  %v2301_v8 = vpop.f32.mrb[15].mxu1 }
 0x544   : > { %v1733_v9 = vcombine.low %v1709_v4, %v1725_v3  ;;  %v1734_v10 = vcombine.high %v1709_v4, %v1725_v3  ;;  %v1749_v11 = vcombine.low %v1716_v5, %v1732_v14  ;;  %v1750_v12 = vcombine.high %v1716_v5, %v1732_v14 }
 0x545   : > { %v1777_v17 = vrot.slane %v1769_v6, %v2698_v33  ;;  %v1784_v19 = vrot.slane %v1770_v7, %v2698_v33 }
 0x546   : > { %v1741_v20 = vrot.slane %v1733_v9, %v2701_v40  ;;  %v1748_v21 = vrot.slane %v1734_v10, %v2701_v40  ;;  %v1757_v22 = vrot.slane %v1749_v11, %v2701_v40  ;;  %v1764_v23 = vrot.slane %v1750_v12, %v2701_v40 }
 0x547   : > { %v1801_v18 = vcombine.low %v1777_v17, %v1793_v13  ;;  %v1802_v50 = vcombine.high %v1777_v17, %v1793_v13  ;;  %v1817_v51 = vcombine.low %v1784_v19, %v1800_v15  ;;  %v1818_v26 = vcombine.high %v1784_v19, %v1800_v15 }
 0x548   : > { %v1837_v27 = vcombine.low %v1741_v20, %v1748_v21  ;;  %v2222_v28 = vcombine.high %v1741_v20, %v1748_v21  ;;  %v1853_v30 = vcombine.low %v1757_v22, %v1764_v23  ;;  %v2223_v31 = vcombine.high %v1757_v22, %v1764_v23 }
 0x549   : > { %v1809_v25 = vrot.slane %v1801_v18, %v2701_v40  ;;  %v1816_v32 = vrot.slane %v1802_v50, %v2701_v40  ;;  %v1825_v24 = vrot.slane %v1817_v51, %v2701_v40  ;;  %v1832_v29 = vrot.slane %v1818_v26, %v2701_v40 }
 0x54a   : > { %v1844_v49 = vrot.slane %v1837_v27, %v2698_v33  ;;  %v1852_v36 = vrot.slane %v2222_v28, %v2698_v33  ;;  %v1860_v38 = vrot.slane %v1853_v30, %v2698_v33  ;;  %v1868_v39 = vrot.slane %v2223_v31, %v2698_v33  ;;  %v2226_v28 = vld [vmem:[%s3041_s4] ss:$0 sm:$0xff] }
 0x54b   : > { %v1905_v37 = vcombine.low %v1809_v25, %v1816_v32  ;;  %v2224_v41 = vcombine.high %v1809_v25, %v1816_v32  ;;  %v1921_v44 = vcombine.low %v1825_v24, %v1832_v29  ;;  %v2225_v35 = vcombine.high %v1825_v24, %v1832_v29 }
 0x54c   : > { %v1870_v48 = vcombine.high %v1844_v49, %v1852_v36  ;;  %v1886_v34 = vcombine.high %v1860_v38, %v1868_v39  ;;  %v1869_v42 = vcombine.low %v1844_v49, %v1852_v36  ;;  %v1885_v45 = vcombine.low %v1860_v38, %v1868_v39 }
 0x54d   : > { %v1912_v47 = vrot.slane %v1905_v37, %v2698_v33  ;;  %v1920_v52 = vrot.slane %v2224_v41, %v2698_v33  ;;  %v1928_v53 = vrot.slane %v1921_v44, %v2698_v33  ;;  %v1936_v54 = vrot.slane %v2225_v35, %v2698_v33  ;;  %v2411_v33 = vld [vmem:[%s3040_s3 + $0x18] sm:$0xff]  }
 0x54e   : > { %v1884_v55 = vrot.slane %v1870_v48, %v2701_v40  ;;  %v1900_v56 = vrot.slane %v1886_v34, %v2701_v40  ;;  %v1877_v57 = vrot.slane %v1869_v42, %v2701_v40  ;;  %v1893_v58 = vrot.slane %v1885_v45, %v2701_v40  ;;  %2315 = vmatpush3.bf16.msra.mxu1 %v2411_v33 }
 0x54f   : > { %v1938_v59 = vcombine.high %v1912_v47, %v1920_v52  ;;  %v1954_v60 = vcombine.high %v1928_v53, %v1936_v54  ;;  %v1937_v61 = vcombine.low %v1912_v47, %v1920_v52  ;;  %v1953_v62 = vcombine.low %v1928_v53, %v1936_v54 }
 0x550   : > { %v1903_v63 = vcombine.low %v1884_v55, %v1900_v56  ;;  %v1901_v0 = vcombine.low %v1877_v57, %v1893_v58  ;;  %v1902_v1 = vcombine.high %v1877_v57, %v1893_v58  ;;  %v1904_v2 = vcombine.high %v1884_v55, %v1900_v56 }
 0x551   : > { %v1952_v3 = vrot.slane %v1938_v59, %v2701_v40  ;;  %v1968_v14 = vrot.slane %v1954_v60, %v2701_v40  ;;  %v1945_v16 = vrot.slane %v1937_v61, %v2701_v40  ;;  %v1961_v4 = vrot.slane %v1953_v62, %v2701_v40 }
 0x553   : > { %v1971_v5 = vcombine.low %v1952_v3, %v1968_v14  ;;  %v1970_v6 = vcombine.high %v1945_v16, %v1961_v4  ;;  %v1969_v43 = vcombine.low %v1945_v16, %v1961_v4  ;;  %v1972_v7 = vcombine.high %v1952_v3, %v1968_v14 }
 0x555   : > { %v2392_v8 = vpack.i.bf16 %v1971_v5, %v1903_v63  ;;  %v2387_v9 = vpack.i.bf16 %v1970_v6, %v1902_v1  ;;  %v2397_v10 = vpack.i.bf16 %v1972_v7, %v1904_v2 }
 0x557   : > { %2393 = vrot.lane.b32.xlu0 %v2392_v8, %s2553_s7  ;;  %2388 = vrot.lane.b32.xlu1 %v2387_v9, %s2554_s30  ;;  %s2478_s7 = scalar_lea.vmem %s2477_s10, 512 }
 0x558   : > { %p2480_p3 = scmp.lt.s32.totalorder %s2478_s7, %s2472_s8 }
 0x55a   : > { %p2481_p4 = por %p2480_p3, %p2479_p2 }
 0x55b   : > { %2398 = vrot.lane.b32.xlu1 %v2397_v10, %s2555_s11 }
 0x55c   : > { %p2482_p7 = pnand %p2481_p4, %p2475_p12 }
 0x5c9   : > { %v2394_v11 = vpop.permute.xlu0 %2393  ;;  %v2389_v12 = vpop.permute.xlu1 %2388 }
 0x5ca   : > { %v2391_v13 = vunpack.i.h.bf16 %v2389_v12  ;;  %v2390_v15 = vunpack.i.l.bf16 %v2389_v12  ;;  %v2396_v40 = vunpack.i.h.bf16 %v2394_v11  ;;  %v2395_v17 = vunpack.i.l.bf16 %v2394_v11 }
 0x5cc   : > { %v1997_v19 = vsel %vm1219_vm3, %v1901_v0, %v2390_v15  ;;  %v1998_v20 = vsel %vm1219_vm3, %v1969_v43, %v2391_v13 }
 0x5cd   : > { %v2399_v21 = vpop.permute.xlu1 %2398  ;;  %v1999_v18 = vsel %vm280_vm1, %v1997_v19, %v2395_v17  ;;  %v2000_v50 = vsel %vm280_vm1, %v1998_v20, %v2396_v40 }
 0x5ce   : > { %v2401_v22 = vunpack.i.h.bf16 %v2399_v21  ;;  %v2400_v23 = vunpack.i.l.bf16 %v2399_v21 }
 0x5d0   : > { %v2002_v51 = vsel %vm2001_vm4, %v1999_v18, %v2400_v23  ;;  %v2003_v26 = vsel %vm2001_vm4, %v2000_v50, %v2401_v22 }
 0x5d1   : > { %v2004_v27 = vpack.c.bf16 %v2003_v26, %v2002_v51 }
 0x5d3   : > { %2317 = vmatmul.mubr.msk.bf16.vlgmr.msra.gmra.mrb[16].mxu1 %vm2044_vm5, %v2004_v27 }
 0x6a6   : > { %v2082_v30 = vpop.f32.mrb[16].mxu1 }
 0x6a7   : > { %v2083_v31 = vadd.f32 %v2226_v28, %v2082_v30  ;;  %v2318_v25 = vpop.f32.mrb[17].mxu1 }
 0x6a8   : > { %v2085_v32 = vpop.f32.mrb[18].mxu1 }
 0x6a9   : > { %2089 = vst.msk [vmem:[%s243_s16] sm:$0xff] %vm280_vm1, %v2083_v31  ;;  %v2086_v24 = vadd.f32 %v2226_v28, %v2085_v32  ;;  %v2319_v29 = vpop.f32.mrb[19].mxu1 }
 0x6ab   : > { %2090 = vst.msk [vmem:[%s243_s16 + $0x8] sm:$0xff] %vm280_vm1, %v2086_v24 }
 0x6ac   : > { %2485 = shalt.err (!%p2482_p7)
}
 0x6ad   : > { %s2486_s30 = scalar_lea.hbm %s2993_s6, 256  ;;  %s2490_s13 = scalar_lea.hbm %s3042_s5, 512 }
 0x6ae   : > { %p2487_p8 = scmp.ne.s32.totalorder %s2993_s6, %s2486_s30  ;;  %p2491_p1 = scmp.lt.u32.totalorder %s2993_s6, %s3042_s5 }
 0x6af   : > { %p2492_p0 = scmp.lt.u32.totalorder %s2490_s13, %s2486_s30  ;;  %p2494_p6 = scmp.lt.u32.totalorder %s2486_s30, %s2993_s6 }
 0x6b0   : > { %p2488_p11 = pnand %p2487_p8, %p3053_p9 }
 0x6b1   : > { %p2493_p5 = por %p2492_p0, %p2491_p1 }
 0x6b2   : > { %p2489_p13 = pneg %p2488_p11 }
 0x6b3   : > { %p2495_p10 = por %p2494_p6, %p2493_p5 }
 0x6b5   : > { %p2496_p12 = pnand %p2495_p10, %p2489_p13 }
 0x6b7   : > { %2499 = shalt.err (!%p2496_p12)
}
 0x6b8   : > { %s2557_s16 = smov 128   ;;  %s2558_s23 = smov 8  }
 0x6b9   : > { %2324 = dma.vmem_to_hbm [thread:$0]  (%p3053_p9), %s2987_s17, 256, %s2993_s6, %s2996_s22, %s2557_s16, %s2557_s16, %s2558_s23  }
 0x6ba PF: > { %p2336_p2 = scmp.ge.s32.totalorder %s2538_s21, 2  ;;  %s2120_s25 = sand.u32 1, %s2526_s18  }
 0x6bb   : > { %p3054_p3 = scmp.ne.s32.totalorder %s3047_s29, 0  ;;  %s2121_s26 = scalar_lea.sflag [#allocation4], %s2120_s25 }
 0x6bd   : > { %p2331_p4 = pnand %p2336_p2, %p3054_p3 }
 0x6bf   : > { %2521 = dma.done.wait (!%p2331_p4), %s2121_s26, 256  }
 0x6c0   : > { %2523 = vsyncadd (!%p2331_p4), %s2121_s26, 4294967040  ;;  %p16_p7 = scmp.ge.s32.totalorder %s2614_s24, 4   ;;  %s3055_s18 = smov %s2530_s19 }
 0x6c1   : > { %s3056_s19 = smov %s2534_s20  ;;  %s3057_s20 = smov %s2625_s27 }
 0x6c2   : > { %s3058_s21 = smov %s2614_s24  ;;  %18 = sbr.rel (!%p16_p7) target bundleno = 4 (0x4), region = 83 }
 0x6c9   :  { %2126 = vsyncpa [#allocation3], 1 }
 0x6ca   :  { %2128 = vsyncpa [#allocation3 + $0x1], 1 }
 0x6cb   :  { %2129 = vsyncpa [#allocation4], 1 }
 0x6cc   :  { %2131 = vsyncpa [#allocation4 + $0x1], 1 }

</bundles_post_ra>
